<compile_context>
chip_gen: v7x
topology: tpu7x:2x2x1
jax: 0.10.0
libtpu: 0.0.40
codegen_flags: <defaults>
</compile_context>

<pallas_src>
import math

import jax
import jax.numpy as jnp
from jax.experimental import pallas as pl
from jax.experimental.pallas import tpu as pltpu


def _simple_time_kernel(x_ref, w_ref, b_ref, o_ref, acc_ref):
    # x_ref:  (TB, TS, D_p)   packed input tile
    # w_ref:  (D_p, D_out_p)  weight, pre-tiled P times and pre-scaled by 1/S
    # b_ref:  (1, D_out_p)    bias (zero-padded lanes)
    # o_ref:  (TB, D_out_p)   output tile (resident across the seq grid axis)
    # acc_ref:(TB, D_p) f32   running seq-sum
    s = pl.program_id(1)

    @pl.when(s == 0)
    def _init():
        acc_ref[...] = jnp.zeros_like(acc_ref)

    # Streaming, lane-dense partial sum over the packed sequence axis.
    acc_ref[...] += jnp.sum(x_ref[...].astype(jnp.float32), axis=1)

    @pl.when(s == pl.num_programs(1) - 1)
    def _finalize():
        # Single small matmul: folds lane-packing AND the 1/S mean (both baked
        # into w_ref by the wrapper), then adds bias. Lane-dense store.
        y = jnp.dot(acc_ref[...], w_ref[...], preferred_element_type=jnp.float32)
        o_ref[...] = (y + b_ref[...]).astype(o_ref.dtype)


def _divisor_tile(n, cap, quantum):
    """Largest divisor of n that is <= cap and a multiple of `quantum`
    (falls back to the whole axis if nothing qualifies -> still legal, just
    a bigger block)."""
    if n <= cap:
        return n
    for d in range(cap, 0, -1):
        if n % d == 0 and d % quantum == 0:
            return d
    return n


def simple_time_model(x, weight, bias):
    """x: (B, S, D_in); weight: (D_out, D_in) torch layout; bias: (D_out,)."""
    B, S, D_in = x.shape
    D_out = weight.shape[0]

    # --- Lane packing: view P consecutive seq steps as one lane-dense row. ---
    P = 128 // math.gcd(D_in, 128)          # smallest P with P*D_in % 128 == 0
    if S % P != 0:
        P = 1                               # still correct, just lane-sparse
    S_p = S // P
    D_p = P * D_in
    x_packed = x.reshape(B, S_p, D_p)       # contiguous reshape: free in XLA

    # --- Fold 1/S into the weight; tile it P times along rows so one matmul
    #     also undoes the lane packing. All done once at trace time. ---
    w_scaled = (weight.T.astype(jnp.float32) / jnp.float32(S))   # (D_in, D_out)
    w_packed = jnp.tile(w_scaled, (P, 1))                        # (D_p, D_out)

    # --- Pad output lanes to a multiple of 128 -> unmasked lane-dense stores. ---
    D_out_p = ((D_out + 127) // 128) * 128
    pad = D_out_p - D_out
    w_packed = jnp.pad(w_packed, ((0, 0), (0, pad)))
    b_padded = jnp.pad(bias.astype(jnp.float32), (0, pad)).reshape(1, D_out_p)

    # --- Tile sizes: ~4 MiB x blocks (double-buffered -> ~8 MiB) keeps every
    #     generation comfortably inside the 32 MiB scoped-VMEM limit while
    #     amortizing the ~0.35us per-grid-step overhead. ---
    TB = _divisor_tile(B, 256, 8)
    bytes_per_row = TB * D_p * x.dtype.itemsize
    budget = 4 * 1024 * 1024                # per x buffer
    TS = S_p
    if S_p * bytes_per_row > budget:
        TS = _divisor_tile(S_p, max(8, budget // bytes_per_row), 8)

    grid = (B // TB, S_p // TS)             # reduction (seq) axis last

    out_padded = pl.pallas_call(
        _simple_time_kernel,
        out_shape=jax.ShapeDtypeStruct((B, D_out_p), x.dtype),
        grid_spec=pltpu.PrefetchScalarGridSpec(
            num_scalar_prefetch=0,
            grid=grid,
            in_specs=[
                pl.BlockSpec((TB, TS, D_p), lambda b, s: (b, s, 0)),
                pl.BlockSpec((D_p, D_out_p), lambda b, s: (0, 0)),   # resident
                pl.BlockSpec((1, D_out_p), lambda b, s: (0, 0)),     # resident
            ],
            out_specs=pl.BlockSpec((TB, D_out_p), lambda b, s: (b, 0)),
            scratch_shapes=[pltpu.VMEM((TB, D_p), jnp.float32)],
        ),
        compiler_params=pltpu.CompilerParams(
            dimension_semantics=("parallel", "arbitrary"),  # batch across TCs
            vmem_limit_bytes=32 * 1024 * 1024,
        ),
    )(x_packed, w_packed, b_padded)

    return out_padded[:, :D_out]


if __name__ == "__main__":
    # Small shapes consistent with the forward: (batch, seq, n_inputs)
    batch, seq, n_inputs, n_outputs = 2, 8, 32, 16

    key = jax.random.PRNGKey(0)
    kx, kw, kb = jax.random.split(key, 3)

    x = jax.random.normal(kx, (batch, seq, n_inputs), dtype=jnp.float32)
    # Deterministic init mimicking nn.Linear's uniform(-1/sqrt(fan_in), ...)
    bound = 1.0 / jnp.sqrt(jnp.float32(n_inputs))
    weight = jax.random.uniform(kw, (n_outputs, n_inputs), jnp.float32,
                                minval=-bound, maxval=bound)
    bias = jax.random.uniform(kb, (n_outputs,), jnp.float32,
                              minval=-bound, maxval=bound)

    out = simple_time_model(x, weight, bias)
    out = jax.block_until_ready(out)

    # Pure-JAX reference (same math as the torch forward).
    flat = x.reshape(-1, n_inputs)
    ref = (flat @ weight.T + bias).reshape(batch, seq, n_outputs).mean(axis=1)
    assert out.shape == (batch, n_outputs)
    assert jnp.allclose(out, ref, atol=1e-5, rtol=1e-5), float(
        jnp.max(jnp.abs(out - ref)))

    print("KERNEL_OK")
</pallas_src>

<mosaic_0001>
module attributes {stable_mosaic.version = 11 : i64} {
  func.func @_simple_time_kernel(%arg0: i32, %arg1: i32, %arg2: memref<2x2x128xf32, #tpu.memory_space<vmem>>, %arg3: memref<128x128xf32, #tpu.memory_space<vmem>>, %arg4: memref<1x128xf32, #tpu.memory_space<vmem>>, %arg5: memref<2x128xf32, #tpu.memory_space<vmem>>, %arg6: memref<2x128xf32, #tpu.memory_space<vmem>>) attributes {dimension_semantics = [#tpu.dimension_semantics<parallel>, #tpu.dimension_semantics<arbitrary>], iteration_bounds = array<i64: 1, 1>, scalar_prefetch = 0 : i64, scratch_operands = 1 : i64, tpu.core_type = #tpu.core_type<tc>, window_params = [{transform_indices = @transform_0, window_bounds = array<i64: 2, 2, 128>}, {pipeline_mode = #tpu.pipeline_mode<synchronous>, transform_indices = @transform_1, window_bounds = array<i64: 128, 128>}, {pipeline_mode = #tpu.pipeline_mode<synchronous>, transform_indices = @transform_2, window_bounds = array<i64: 1, 128>}, {transform_indices = @transform_3, window_bounds = array<i64: 2, 128>}]} {
    %c0_i32 = arith.constant 0 : i32
    %0 = arith.cmpi eq, %arg1, %c0_i32 : i32
    %1 = arith.extui %0 : i1 to i32
    %c0_i32_0 = arith.constant 0 : i32
    %2 = arith.cmpi ne, %1, %c0_i32_0 : i32
    scf.if %2 {
      %cst_9 = arith.constant 0.000000e+00 : f32
      %11 = vector.broadcast %cst_9 : f32 to vector<2x128xf32>
      %c0_10 = arith.constant 0 : index
      %c0_11 = arith.constant 0 : index
      %12 = vector.load %arg6[%c0_10, %c0_11] : memref<2x128xf32, #tpu.memory_space<vmem>>, vector<2x128xf32>
      tpu.vector_store %arg6[%c0_10, %c0_11], %11 {strides = array<i32>} : memref<2x128xf32, #tpu.memory_space<vmem>>, vector<2x128xf32>,
    } else {
    }
    %c0 = arith.constant 0 : index
    %c0_1 = arith.constant 0 : index
    %3 = vector.load %arg6[%c0, %c0_1] : memref<2x128xf32, #tpu.memory_space<vmem>>, vector<2x128xf32>
    %c0_2 = arith.constant 0 : index
    %c0_3 = arith.constant 0 : index
    %c0_4 = arith.constant 0 : index
    %4 = vector.load %arg2[%c0_2, %c0_3, %c0_4] : memref<2x2x128xf32, #tpu.memory_space<vmem>>, vector<2x2x128xf32>
    %cst = arith.constant dense<0.000000e+00> : vector<2x128xf32>
    %5 = vector.multi_reduction <add>, %4, %cst [1] : vector<2x2x128xf32> to vector<2x128xf32>
    %6 = arith.addf %3, %5 : vector<2x128xf32>
    %c0_5 = arith.constant 0 : index
    %c0_6 = arith.constant 0 : index
    %7 = vector.load %arg6[%c0_5, %c0_6] : memref<2x128xf32, #tpu.memory_space<vmem>>, vector<2x128xf32>
    tpu.vector_store %arg6[%c0_5, %c0_6], %6 {strides = array<i32>} : memref<2x128xf32, #tpu.memory_space<vmem>>, vector<2x128xf32>,
    %c0_i32_7 = arith.constant 0 : i32
    %8 = arith.cmpi eq, %arg1, %c0_i32_7 : i32
    %9 = arith.extui %8 : i1 to i32
    %c0_i32_8 = arith.constant 0 : i32
    %10 = arith.cmpi ne, %9, %c0_i32_8 : i32
    scf.if %10 {
      %c0_9 = arith.constant 0 : index
      %c0_10 = arith.constant 0 : index
      %11 = vector.load %arg6[%c0_9, %c0_10] : memref<2x128xf32, #tpu.memory_space<vmem>>, vector<2x128xf32>
      %c0_11 = arith.constant 0 : index
      %c0_12 = arith.constant 0 : index
      %12 = vector.load %arg3[%c0_11, %c0_12] : memref<128x128xf32, #tpu.memory_space<vmem>>, vector<128x128xf32>
      %cst_13 = arith.constant dense<0.000000e+00> : vector<2x128xf32>
      %13 = tpu.matmul %11, %12, %cst_13 {dimension_numbers = #tpu.dot_dimension_numbers<[1], [0], [0], [1], [0, 0, 1, 1], [], []>} : vector<2x128xf32>, vector<128x128xf32>, vector<2x128xf32> -> vector<2x128xf32>
      %c0_14 = arith.constant 0 : index
      %c0_15 = arith.constant 0 : index
      %14 = vector.load %arg4[%c0_14, %c0_15] : memref<1x128xf32, #tpu.memory_space<vmem>>, vector<1x128xf32>
      %15 = vector.broadcast %14 : vector<1x128xf32> to vector<2x128xf32>
      %16 = arith.addf %13, %15 : vector<2x128xf32>
      %c0_16 = arith.constant 0 : index
      %c0_17 = arith.constant 0 : index
      %17 = vector.load %arg5[%c0_16, %c0_17] : memref<2x128xf32, #tpu.memory_space<vmem>>, vector<2x128xf32>
      tpu.vector_store %arg5[%c0_16, %c0_17], %16 {strides = array<i32>} : memref<2x128xf32, #tpu.memory_space<vmem>>, vector<2x128xf32>,
    } else {
    }
    return
  }
  func.func @transform_0(%arg0: i32, %arg1: i32) -> (i32, i32, i32) {
    %c0_i32 = arith.constant 0 : i32
    %c0_i32_0 = arith.constant 0 : i32
    return %arg0, %arg1, %c0_i32 : i32, i32, i32
  }
  func.func @transform_1(%arg0: i32, %arg1: i32) -> (i32, i32) {
    %c0_i32 = arith.constant 0 : i32
    %c0_i32_0 = arith.constant 0 : i32
    %c0_i32_1 = arith.constant 0 : i32
    return %c0_i32, %c0_i32_0 : i32, i32
  }
  func.func @transform_2(%arg0: i32, %arg1: i32) -> (i32, i32) {
    %c0_i32 = arith.constant 0 : i32
    %c0_i32_0 = arith.constant 0 : i32
    %c0_i32_1 = arith.constant 0 : i32
    return %c0_i32, %c0_i32_0 : i32, i32
  }
  func.func @transform_3(%arg0: i32, %arg1: i32) -> (i32, i32) {
    %c0_i32 = arith.constant 0 : i32
    %c0_i32_0 = arith.constant 0 : i32
    return %arg0, %c0_i32 : i32, i32
  }
}

</mosaic_0001>

<bundles_post_ra>
// kernel: tpu_custom_call.1
= control target key start
LH: loop header
LB: loop body
LE: loop exit
PB: predicated region body
PF: predicated region fallthrough
CT: control target
= control target key end

     0   :  { %8 = vsyncpa [#allocation4], 0  ;;  %s423_s0 = inlined_call_operand.hbm [shape: f32[2,2,128], index: 0, kind: input, shape index: {}]   ;;  %s424_s1 = inlined_call_operand.hbm [shape: f32[128,128], index: 1, kind: input, shape index: {}]   ;;  %s425_s2 = inlined_call_operand.vmem [shape: f32[1,128], index: 2, kind: input, shape index: {}]   ;;  %s426_s3 = inlined_call_operand.hbm [shape: f32[2,128], index: 3, kind: output, shape index: {}]  }
   0x1   :  { %9 = vsyncpa [#allocation7], 0 }
   0x2   :  { %10 = vsyncpa [#allocation5], 0  ;;  %s346_s12 = smov [#allocation3]   ;;  %s274_s16 = scalar_lea.hbm %s423_s0, 64 }
   0x3   :  { %s16_s13 = sshll.u32 %s346_s12, 4  ;;  %p275_p0 = scmp.ne.s32.totalorder %s423_s0, %s274_s16  ;;  %s17_s13 = int_to_ptr.vmem [resolvable:$true] %s16_s13 }
   0x4   :  { %p278_p1 = scmp.lt.u32.totalorder %s274_s16, %s423_s0 }
   0x6   :  { %p280_p2 = pnand %p278_p1, %p275_p0 }
   0x8   :  { %283 = shalt.err (!%p280_p2)
}
   0x9   :  { %s284_s21 = scalar_lea.vmem %s17_s13, 64  ;;  %p289_p4 = scmp.lt.s32.totalorder %s17_s13, %s17_s13 }
   0xa   :  { %p285_p3 = scmp.ne.s32.totalorder %s17_s13, %s284_s21  ;;  %p290_p5 = scmp.lt.s32.totalorder %s284_s21, %s284_s21 }
   0xc   :  { %p291_p6 = por %p290_p5, %p289_p4 }
   0xe   :  { %p292_p7 = pnand %p291_p6, %p285_p3 }
  0x10   :  { %295 = shalt.err (!%p292_p7)
}
  0x11   :  { %s347_s22 = smov 32   ;;  %s348_s23 = smov 2  }
  0x12   :  { %22 = dma.hbm_to_vmem [thread:$0]  %s423_s0, 64, %s17_s13, [#allocation4], %s347_s22, %s347_s22, %s348_s23  }
  0x13   :  { %s349_s26 = smov [#allocation6]   ;;  %s296_s30 = scalar_lea.hbm %s424_s1, 2048 }
  0x14   :  { %s28_s27 = sshll.u32 %s349_s26, 4  ;;  %p297_p8 = scmp.ne.s32.totalorder %s424_s1, %s296_s30  ;;  %s29_s27 = int_to_ptr.vmem [resolvable:$true] %s28_s27 }
  0x15   :  { %p300_p9 = scmp.lt.u32.totalorder %s296_s30, %s424_s1 }
  0x17   :  { %p302_p10 = pnand %p300_p9, %p297_p8 }
  0x19   :  { %305 = shalt.err (!%p302_p10)
}
  0x1a   :  { %s306_s8 = scalar_lea.vmem %s29_s27, 2048  ;;  %p311_p12 = scmp.lt.s32.totalorder %s29_s27, %s29_s27 }
  0x1b   :  { %p307_p11 = scmp.ne.s32.totalorder %s29_s27, %s306_s8  ;;  %p312_p13 = scmp.lt.s32.totalorder %s306_s8, %s306_s8 }
  0x1d   :  { %p313_p0 = por %p312_p13, %p311_p12 }
  0x1f   :  { %p314_p1 = pnand %p313_p0, %p307_p11 }
  0x21   :  { %317 = shalt.err (!%p314_p1)
}
  0x22   :  { %s350_s0 = smov 128   ;;  %s351_s9 = smov 8  }
  0x23   :  { %34 = dma.hbm_to_vmem [thread:$0]  %s424_s1, 2048, %s29_s27, [#allocation7], %s350_s0, %s350_s0, %s351_s9  }
  0x24   :  { %340 = dma.done.wait [#allocation4], 64  }
  0x25   :  { %341 = vsyncadd [#allocation4], 4294967232 }
  0x26   :  { %342 = dma.done.wait [#allocation7], 2048  }
  0x27   :  { %343 = vsyncadd [#allocation7], 4294965248  ;;  %v352_v0 = vmov 0.0|0.0   ;;  %v353_v1 = vmov 0.0   ;;  %vm354_vm0 = vmmov 0   ;;  %v77_v2 = vld [vmem:[#allocation6] sm:$0xff] }
  0x28   :  { %240 = vmatprep.subr.bf16.mxu0 %v352_v0  ;;  %47 = vst [vmem:[#allocation2] sm:$0x3] %v353_v1  ;;  %237 = vmatprep.mubr.msk.f32.mxu0 %vm354_vm0, %v353_v1  ;;  %v78_v3 = vld [vmem:[#allocation6 + $0x8] sm:$0xff]  ;;  %v79_v4 = vld [vmem:[#allocation6 + $0x10] sm:$0xff]  ;;  %v80_v6 = vld [vmem:[#allocation6 + $0x18] sm:$0xff]  ;;  %vm51_vm1 = vcmask 1041408  }
  0x29   :  { %v241_v5 = vpack.c.bf16 %v78_v3, %v77_v2  ;;  %v244_v7 = vpack.c.bf16 %v80_v6, %v79_v4  ;;  %v81_v8 = vld [vmem:[#allocation6 + $0x20] sm:$0xff]  ;;  %v82_v9 = vld [vmem:[#allocation6 + $0x28] sm:$0xff]  ;;  %v49_v10 = vld [vmem:[#allocation3] sm:$0x3]  ;;  %vm68_vm2 = vcmask 1041409   ;;  %s355_s13 = smov [#allocation8]  }
  0x2a   :  { %v50_v11 = vld [vmem:[#allocation3 + $0x2] sm:$0x3]  ;;  %v52_v12 = vsel %vm51_vm1, %v49_v10, 0.0  ;;  %v247_v13 = vpack.c.bf16 %v82_v9, %v81_v8  ;;  %v83_v16 = vld [vmem:[#allocation6 + $0x30] sm:$0xff]  ;;  %v85_v23 = vld [vmem:[#allocation6 + $0x40] sm:$0xff]  ;;  %s177_s14 = sshll.u32 %s355_s13, 4  ;;  %s178_s14 = int_to_ptr.vmem [resolvable:$true] %s177_s14 }
  0x2b   :  { %242 = vmatpush3.bf16.msra.mxu0 %v241_v5  ;;  %v53_v14 = vrot.slane %v52_v12, 4  ;;  %v59_v15 = vsel %vm51_vm1, %v50_v11, 0.0  ;;  %v84_v17 = vld [vmem:[#allocation6 + $0x38] sm:$0xff]  ;;  %v86_v24 = vld [vmem:[#allocation6 + $0x48] sm:$0xff]  ;;  %v87_v30 = vld [vmem:[#allocation6 + $0x50] sm:$0xff]  ;;  %s318_s15 = scalar_lea.vmem %s178_s14, 32  ;;  %p323_p3 = scmp.lt.s32.totalorder %s178_s14, %s178_s14 }
  0x2c   :  { %243 = vmatprep.subr.bf16.mxu0 %v352_v0  ;;  %v60_v18 = vrot.slane %v59_v15, 4  ;;  %v250_v21 = vpack.c.bf16 %v84_v17, %v83_v16  ;;  %v253_v28 = vpack.c.bf16 %v86_v24, %v85_v23  ;;  %v88_v31 = vld [vmem:[#allocation6 + $0x58] sm:$0xff]  ;;  %v89_v37 = vld [vmem:[#allocation6 + $0x60] sm:$0xff]  ;;  %v90_v38 = vld [vmem:[#allocation6 + $0x68] sm:$0xff]  ;;  %p319_p2 = scmp.ne.s32.totalorder %s178_s14, %s318_s15  ;;  %p324_p4 = scmp.lt.s32.totalorder %s318_s15, %s318_s15 }
  0x2d   :  { %v54_v19 = vadd.f32 %v53_v14, %v52_v12  ;;  %v256_v36 = vpack.c.bf16 %v88_v31, %v87_v30  ;;  %v259_v41 = vpack.c.bf16 %v90_v38, %v89_v37  ;;  %v91_v42 = vld [vmem:[#allocation6 + $0x70] sm:$0xff]  ;;  %v92_v43 = vld [vmem:[#allocation6 + $0x78] sm:$0xff] }
  0x2e   :  { %v61_v20 = vadd.f32 %v60_v18, %v59_v15  ;;  %v262_v44 = vpack.c.bf16 %v92_v43, %v91_v42  ;;  %v187_v46 = vld [vmem:[%s425_s2] ss:$0 sm:$0xff]  ;;  %p325_p5 = por %p324_p4, %p323_p3 }
  0x2f   :  { %245 = vmatpush3.bf16.msra.mxu0 %v244_v7  ;;  %v55_v22 = vrot.slane %v54_v19, 2  ;;  %v48_v34 = vld [vmem:[#allocation2] sm:$0x3] }
  0x30   :  { %246 = vmatprep.subr.bf16.mxu0 %v352_v0  ;;  %v62_v25 = vrot.slane %v61_v20, 2  ;;  %p326_p6 = pnand %p325_p5, %p319_p2 }
  0x31   :  { %v56_v26 = vadd.f32 %v55_v22, %v54_v19 }
  0x32   :  { %v63_v27 = vadd.f32 %v62_v25, %v61_v20 }
  0x33   :  { %248 = vmatpush3.bf16.msra.mxu0 %v247_v13  ;;  %v57_v29 = vrot.slane %v56_v26, 1 }
  0x34   :  { %249 = vmatprep.subr.bf16.mxu0 %v352_v0  ;;  %v64_v32 = vrot.slane %v63_v27, 1 }
  0x35   :  { %v58_v33 = vadd.f32 %v57_v29, %v56_v26 }
  0x36   :  { %v65_v35 = vadd.f32 %v64_v32, %v63_v27 }
  0x37   :  { %251 = vmatpush3.bf16.msra.mxu0 %v250_v21 }
  0x38   :  { %252 = vmatprep.subr.bf16.mxu0 %v352_v0  ;;  %v69_v39 = vsel %vm68_vm2, %v65_v35, %v58_v33 }
  0x39   :  { %v71_v40 = vadd.f32 %v69_v39, %v48_v34 }
  0x3b   :  { %254 = vmatpush3.bf16.msra.mxu0 %v253_v28  ;;  %72 = vst [vmem:[#allocation2] sm:$0x3] %v71_v40 }
  0x3c   :  { %255 = vmatprep.subr.bf16.mxu0 %v352_v0 }
  0x3f   :  { %257 = vmatpush3.bf16.msra.mxu0 %v256_v36 }
  0x40   :  { %258 = vmatprep.subr.bf16.mxu0 %v352_v0 }
  0x42   :  { %v76_v45 = vld [vmem:[#allocation2] sm:$0x3] }
  0x43   :  { %260 = vmatpush3.bf16.msra.mxu0 %v259_v41 }
  0x44   :  { %261 = vmatprep.subr.bf16.mxu0 %v352_v0 }
  0x47   :  { %263 = vmatpush3.bf16.msra.mxu0 %v262_v44 }
  0x4a   :  { %238 = vmatmul.mubr.f32.vlgmr.msra.gmra.mrb[0].mxu0 %v76_v45 }
 0x11d   :  { %v166_v47 = vpop.f32.mrb[0].mxu0 }
 0x11e   :  { %v167_v48 = vadd.f32 %v187_v46, %v166_v47  ;;  %v239_v49 = vpop.f32.mrb[1].mxu0 }
 0x120   :  { %170 = vst [vmem:[#allocation8] sm:$0x3] %v167_v48 }
 0x121   :  { %329 = shalt.err (!%p326_p6)
}
 0x122   :  { %s330_s18 = scalar_lea.hbm %s426_s3, 32 }
 0x123   :  { %p331_p7 = scmp.ne.s32.totalorder %s426_s3, %s330_s18  ;;  %p334_p8 = scmp.lt.u32.totalorder %s330_s18, %s426_s3 }
 0x125   :  { %p336_p9 = pnand %p334_p8, %p331_p7 }
 0x127   :  { %339 = shalt.err (!%p336_p9)
}
 0x128   :  { %180 = dma.vmem_to_hbm [thread:$0]  %s178_s14, 32, %s426_s3, [#allocation5]  }
 0x129   :  { %344 = dma.done.wait [#allocation5], 32  }
 0x12a   :  { %345 = vsyncadd [#allocation5], 4294967264 }
 0x12b   :  { %184 = vsyncpa [#allocation4], 1 }
 0x12c   :  { %185 = vsyncpa [#allocation7], 1 }
 0x12d   :  { %186 = vsyncpa [#allocation5], 1 }

</bundles_post_ra>
